<compile_context>
chip_gen: v7x
topology: tpu7x:2x2x1
jax: 0.10.0
libtpu: 0.0.40
codegen_flags: <defaults>
</compile_context>

<pallas_src>
import jax
import jax.numpy as jnp
from jax.experimental import pallas as pl
from jax.experimental.pallas import tpu as pltpu


def gaussian_fc_kernel(x_ref, w1_ref, b1_ref, w2_ref, b2_ref,
                       wh_ref, bh_ref, out_ref):
    # shared layer 1: Linear + (Dropout2d == identity at eval) + ReLU
    h = jnp.dot(x_ref[...], w1_ref[...],
                preferred_element_type=jnp.float32) + b1_ref[...]
    h = jnp.maximum(h, 0.0)
    # shared layer 2: Linear + ReLU
    h = jnp.dot(h.astype(w2_ref.dtype), w2_ref[...],
                preferred_element_type=jnp.float32) + b2_ref[...]
    h = jnp.maximum(h, 0.0)
    # fused gaussian heads: one matmul producing [means | log_vars]
    out = jnp.dot(h.astype(wh_ref.dtype), wh_ref[...],
                  preferred_element_type=jnp.float32) + bh_ref[...]
    out_ref[...] = out.astype(out_ref.dtype)


def gaussian_fc(x, params, *, tb=512, matmul_dtype=jnp.bfloat16):
    """x: [B, neurons[0]] float32. params: dict of weights/biases.

    Returns (means, log_vars), each [B, neurons[-1]].
    """
    B, D0 = x.shape
    w1, b1 = params["w1"], params["b1"]   # (D0, D1), (1, D1)
    w2, b2 = params["w2"], params["b2"]   # (D1, D2), (1, D2)
    wm, bm = params["wm"], params["bm"]   # (D2, D3), (1, D3)
    wv, bv = params["wv"], params["bv"]   # (D2, D3), (1, D3)
    D1, D2, D3 = w1.shape[1], w2.shape[1], wm.shape[1]

    # Fuse the two heads into a single matmul with a lane-denser output.
    wh = jnp.concatenate([wm, wv], axis=1)        # (D2, 2*D3)
    bh = jnp.concatenate([bm, bv], axis=1)        # (1, 2*D3)

    # MXU operands in matmul_dtype (bf16 by default); biases stay f32.
    x_mm = x.astype(matmul_dtype)
    w1_mm = w1.astype(matmul_dtype)
    w2_mm = w2.astype(matmul_dtype)
    wh_mm = wh.astype(matmul_dtype)

    # Batch tile: large (default 512, multiple of 8) but never bigger than B.
    # If tb == B, the block equals the full dim, which is always legal.
    tb = min(tb, B)
    grid = (pl.cdiv(B, tb),)

    # Weights/biases are fully resident each grid step (constant index_map).
    full = lambda shape: pl.BlockSpec(shape, lambda i: (0,) * len(shape))

    mm_bytes = jnp.dtype(matmul_dtype).itemsize
    flops = 2 * B * (D0 * D1 + D1 * D2 + D2 * 2 * D3)
    bytes_accessed = (B * D0 * mm_bytes
                      + (D0 * D1 + D1 * D2 + D2 * 2 * D3) * mm_bytes
                      + (D1 + D2 + 2 * D3) * 4
                      + B * 2 * D3 * x.dtype.itemsize)

    out = pl.pallas_call(
        gaussian_fc_kernel,
        out_shape=jax.ShapeDtypeStruct((B, 2 * D3), x.dtype),
        grid_spec=pltpu.PrefetchScalarGridSpec(
            num_scalar_prefetch=0,
            grid=grid,
            in_specs=[
                pl.BlockSpec((tb, D0), lambda i: (i, 0)),   # x tile
                full((D0, D1)), full((1, D1)),
                full((D1, D2)), full((1, D2)),
                full((D2, 2 * D3)), full((1, 2 * D3)),
            ],
            out_specs=pl.BlockSpec((tb, 2 * D3), lambda i: (i, 0)),
        ),
        compiler_params=pltpu.CompilerParams(
            dimension_semantics=("parallel",)),
        cost_estimate=pl.CostEstimate(
            flops=flops, transcendentals=0, bytes_accessed=bytes_accessed),
    )(x_mm, w1_mm, b1, w2_mm, b2, wh_mm, bh)

    means = out[:, :D3]
    log_vars = out[:, D3:]
    return means, log_vars


def init_params(key, neurons):
    """Deterministic synthetic init matching nn.Linear shapes.

    neurons = [D0, D1, D2, D3]  ->  shared: Linear(D0,D1), Linear(D1,D2)
                                    heads:  means/log_vars Linear(D2,D3)
    Weights stored transposed as [in, out].
    """
    def linear(key, fan_in, fan_out):
        kw, kb = jax.random.split(key)
        bound = 1.0 / jnp.sqrt(fan_in)
        w = jax.random.uniform(kw, (fan_in, fan_out), jnp.float32,
                               -bound, bound)
        b = jax.random.uniform(kb, (1, fan_out), jnp.float32, -bound, bound)
        return w, b

    k1, k2, k3, k4 = jax.random.split(key, 4)
    w1, b1 = linear(k1, neurons[0], neurons[1])
    w2, b2 = linear(k2, neurons[1], neurons[2])
    wm, bm = linear(k3, neurons[2], neurons[3])
    wv, bv = linear(k4, neurons[2], neurons[3])
    return dict(w1=w1, b1=b1, w2=w2, b2=b2, wm=wm, bm=bm, wv=wv, bv=bv)


def reference(x, p, matmul_dtype=None):
    """Pure-JAX reference. If matmul_dtype is given, mirror the kernel's
    operand casting (bf16 matmul operands, f32 accumulation)."""
    def mm(a, b):
        if matmul_dtype is not None:
            a = a.astype(matmul_dtype)
            b = b.astype(matmul_dtype)
        return jnp.dot(a, b, preferred_element_type=jnp.float32)
    h = jnp.maximum(mm(x, p["w1"]) + p["b1"], 0.0)
    h = jnp.maximum(mm(h, p["w2"]) + p["b2"], 0.0)
    return mm(h, p["wm"]) + p["bm"], mm(h, p["wv"]) + p["bv"]


if __name__ == "__main__":
    # params equivalent to:
    #   Gaussian_FC(params={'neurons': [32, 64, 64, 16],
    #                       'dropouts': [0.1, 0.2, 0.3],
    #                       'end_layer': False})
    neurons = [32, 64, 64, 16]

    key = jax.random.PRNGKey(0)
    kx, kp, kx2 = jax.random.split(key, 3)
    params = init_params(kp, neurons)

    # --- small-batch check (bf16 matmul operands, default fast path) ---
    B = 8
    x = jax.random.normal(kx, (B, neurons[0]), jnp.float32)
    means, log_vars = gaussian_fc(x, params)               # bf16 operands
    jax.block_until_ready((means, log_vars))
    ref_m_bf, ref_v_bf = reference(x, params, jnp.bfloat16)
    ref_m_f32, ref_v_f32 = reference(x, params)
    assert means.shape == (B, neurons[-1])
    assert log_vars.shape == (B, neurons[-1])
    assert jnp.allclose(means, ref_m_bf, atol=1e-2, rtol=1e-2)
    assert jnp.allclose(log_vars, ref_v_bf, atol=1e-2, rtol=1e-2)
    assert jnp.allclose(means, ref_m_f32, atol=5e-2, rtol=5e-2)
    assert jnp.allclose(log_vars, ref_v_f32, atol=5e-2, rtol=5e-2)

    # --- f32-operand path, tighter tolerance ---
    means32, log_vars32 = gaussian_fc(x, params, matmul_dtype=jnp.float32)
    jax.block_until_ready((means32, log_vars32))
    assert jnp.allclose(means32, ref_m_f32, atol=1e-4, rtol=1e-4)
    assert jnp.allclose(log_vars32, ref_v_f32, atol=1e-4, rtol=1e-4)

    # --- larger batch: exercises multiple grid steps (tb=256 -> grid=(4,)) ---
    B2 = 1024
    x2 = jax.random.normal(kx2, (B2, neurons[0]), jnp.float32)
    m2, v2 = gaussian_fc(x2, params, tb=256)
    jax.block_until_ready((m2, v2))
    ref_m2, ref_v2 = reference(x2, params, jnp.bfloat16)
    assert m2.shape == (B2, neurons[-1]) and v2.shape == (B2, neurons[-1])
    assert jnp.allclose(m2, ref_m2, atol=1e-2, rtol=1e-2)
    assert jnp.allclose(v2, ref_v2, atol=1e-2, rtol=1e-2)

    print("KERNEL_OK")
</pallas_src>

<mosaic_0001>
module attributes {stable_mosaic.version = 11 : i64} {
  func.func @gaussian_fc_kernel(%arg0: i32, %arg1: memref<8x32xbf16, #tpu.memory_space<vmem>>, %arg2: memref<32x64xbf16, #tpu.memory_space<vmem>>, %arg3: memref<1x64xf32, #tpu.memory_space<vmem>>, %arg4: memref<64x64xbf16, #tpu.memory_space<vmem>>, %arg5: memref<1x64xf32, #tpu.memory_space<vmem>>, %arg6: memref<64x32xbf16, #tpu.memory_space<vmem>>, %arg7: memref<1x32xf32, #tpu.memory_space<vmem>>, %arg8: memref<8x32xf32, #tpu.memory_space<vmem>>) attributes {dimension_semantics = [#tpu.dimension_semantics<parallel>], iteration_bounds = array<i64: 1>, scalar_prefetch = 0 : i64, scratch_operands = 0 : i64, tpu.core_type = #tpu.core_type<tc>, window_params = [{transform_indices = @transform_0, window_bounds = array<i64: 8, 32>}, {pipeline_mode = #tpu.pipeline_mode<synchronous>, transform_indices = @transform_1, window_bounds = array<i64: 32, 64>}, {pipeline_mode = #tpu.pipeline_mode<synchronous>, transform_indices = @transform_2, window_bounds = array<i64: 1, 64>}, {pipeline_mode = #tpu.pipeline_mode<synchronous>, transform_indices = @transform_3, window_bounds = array<i64: 64, 64>}, {pipeline_mode = #tpu.pipeline_mode<synchronous>, transform_indices = @transform_4, window_bounds = array<i64: 1, 64>}, {pipeline_mode = #tpu.pipeline_mode<synchronous>, transform_indices = @transform_5, window_bounds = array<i64: 64, 32>}, {pipeline_mode = #tpu.pipeline_mode<synchronous>, transform_indices = @transform_6, window_bounds = array<i64: 1, 32>}, {transform_indices = @transform_7, window_bounds = array<i64: 8, 32>}]} {
    %c0 = arith.constant 0 : index
    %c0_0 = arith.constant 0 : index
    %0 = vector.load %arg1[%c0, %c0_0] : memref<8x32xbf16, #tpu.memory_space<vmem>>, vector<8x32xbf16>
    %c0_1 = arith.constant 0 : index
    %c0_2 = arith.constant 0 : index
    %1 = vector.load %arg2[%c0_1, %c0_2] : memref<32x64xbf16, #tpu.memory_space<vmem>>, vector<32x64xbf16>
    %cst = arith.constant dense<0.000000e+00> : vector<8x64xf32>
    %2 = tpu.matmul %0, %1, %cst {dimension_numbers = #tpu.dot_dimension_numbers<[1], [0], [0], [1], [0, 0, 1, 1], [], []>} : vector<8x32xbf16>, vector<32x64xbf16>, vector<8x64xf32> -> vector<8x64xf32>
    %c0_3 = arith.constant 0 : index
    %c0_4 = arith.constant 0 : index
    %3 = vector.load %arg3[%c0_3, %c0_4] : memref<1x64xf32, #tpu.memory_space<vmem>>, vector<1x64xf32>
    %4 = vector.broadcast %3 : vector<1x64xf32> to vector<8x64xf32>
    %5 = arith.addf %2, %4 : vector<8x64xf32>
    %cst_5 = arith.constant 0.000000e+00 : f32
    %6 = vector.broadcast %cst_5 : f32 to vector<8x64xf32>
    %7 = arith.maximumf %5, %6 : vector<8x64xf32>
    %8 = arith.truncf %7 : vector<8x64xf32> to vector<8x64xbf16>
    %c0_6 = arith.constant 0 : index
    %c0_7 = arith.constant 0 : index
    %9 = vector.load %arg4[%c0_6, %c0_7] : memref<64x64xbf16, #tpu.memory_space<vmem>>, vector<64x64xbf16>
    %cst_8 = arith.constant dense<0.000000e+00> : vector<8x64xf32>
    %10 = tpu.matmul %8, %9, %cst_8 {dimension_numbers = #tpu.dot_dimension_numbers<[1], [0], [0], [1], [0, 0, 1, 1], [], []>} : vector<8x64xbf16>, vector<64x64xbf16>, vector<8x64xf32> -> vector<8x64xf32>
    %c0_9 = arith.constant 0 : index
    %c0_10 = arith.constant 0 : index
    %11 = vector.load %arg5[%c0_9, %c0_10] : memref<1x64xf32, #tpu.memory_space<vmem>>, vector<1x64xf32>
    %12 = vector.broadcast %11 : vector<1x64xf32> to vector<8x64xf32>
    %13 = arith.addf %10, %12 : vector<8x64xf32>
    %cst_11 = arith.constant 0.000000e+00 : f32
    %14 = vector.broadcast %cst_11 : f32 to vector<8x64xf32>
    %15 = arith.maximumf %13, %14 : vector<8x64xf32>
    %16 = arith.truncf %15 : vector<8x64xf32> to vector<8x64xbf16>
    %c0_12 = arith.constant 0 : index
    %c0_13 = arith.constant 0 : index
    %17 = vector.load %arg6[%c0_12, %c0_13] : memref<64x32xbf16, #tpu.memory_space<vmem>>, vector<64x32xbf16>
    %cst_14 = arith.constant dense<0.000000e+00> : vector<8x32xf32>
    %18 = tpu.matmul %16, %17, %cst_14 {dimension_numbers = #tpu.dot_dimension_numbers<[1], [0], [0], [1], [0, 0, 1, 1], [], []>} : vector<8x64xbf16>, vector<64x32xbf16>, vector<8x32xf32> -> vector<8x32xf32>
    %c0_15 = arith.constant 0 : index
    %c0_16 = arith.constant 0 : index
    %19 = vector.load %arg7[%c0_15, %c0_16] : memref<1x32xf32, #tpu.memory_space<vmem>>, vector<1x32xf32>
    %20 = vector.broadcast %19 : vector<1x32xf32> to vector<8x32xf32>
    %21 = arith.addf %18, %20 : vector<8x32xf32>
    %c0_17 = arith.constant 0 : index
    %c0_18 = arith.constant 0 : index
    %22 = vector.load %arg8[%c0_17, %c0_18] : memref<8x32xf32, #tpu.memory_space<vmem>>, vector<8x32xf32>
    tpu.vector_store %arg8[%c0_17, %c0_18], %21 {strides = array<i32>} : memref<8x32xf32, #tpu.memory_space<vmem>>, vector<8x32xf32>,
    return
  }
  func.func @transform_0(%arg0: i32) -> (i32, i32) {
    %c0_i32 = arith.constant 0 : i32
    %c0_i32_0 = arith.constant 0 : i32
    return %arg0, %c0_i32 : i32, i32
  }
  func.func @transform_1(%arg0: i32) -> (i32, i32) {
    %c0_i32 = arith.constant 0 : i32
    %c0_i32_0 = arith.constant 0 : i32
    %c0_i32_1 = arith.constant 0 : i32
    return %c0_i32, %c0_i32_0 : i32, i32
  }
  func.func @transform_2(%arg0: i32) -> (i32, i32) {
    %c0_i32 = arith.constant 0 : i32
    %c0_i32_0 = arith.constant 0 : i32
    %c0_i32_1 = arith.constant 0 : i32
    return %c0_i32, %c0_i32_0 : i32, i32
  }
  func.func @transform_3(%arg0: i32) -> (i32, i32) {
    %c0_i32 = arith.constant 0 : i32
    %c0_i32_0 = arith.constant 0 : i32
    %c0_i32_1 = arith.constant 0 : i32
    return %c0_i32, %c0_i32_0 : i32, i32
  }
  func.func @transform_4(%arg0: i32) -> (i32, i32) {
    %c0_i32 = arith.constant 0 : i32
    %c0_i32_0 = arith.constant 0 : i32
    %c0_i32_1 = arith.constant 0 : i32
    return %c0_i32, %c0_i32_0 : i32, i32
  }
  func.func @transform_5(%arg0: i32) -> (i32, i32) {
    %c0_i32 = arith.constant 0 : i32
    %c0_i32_0 = arith.constant 0 : i32
    %c0_i32_1 = arith.constant 0 : i32
    return %c0_i32, %c0_i32_0 : i32, i32
  }
  func.func @transform_6(%arg0: i32) -> (i32, i32) {
    %c0_i32 = arith.constant 0 : i32
    %c0_i32_0 = arith.constant 0 : i32
    %c0_i32_1 = arith.constant 0 : i32
    return %c0_i32, %c0_i32_0 : i32, i32
  }
  func.func @transform_7(%arg0: i32) -> (i32, i32) {
    %c0_i32 = arith.constant 0 : i32
    %c0_i32_0 = arith.constant 0 : i32
    return %arg0, %c0_i32 : i32, i32
  }
}

</mosaic_0001>

<bundles_post_ra>
// kernel: tpu_custom_call.1
= control target key start
LH: loop header
LB: loop body
LE: loop exit
PB: predicated region body
PF: predicated region fallthrough
CT: control target
= control target key end

     0   :  { %12 = vsyncpa [#allocation3], 0  ;;  %s530_s0 = inlined_call_operand.hbm [shape: bf16[8,32], index: 0, kind: input, shape index: {}]   ;;  %s531_s1 = inlined_call_operand.vmem [shape: bf16[32,64], index: 1, kind: input, shape index: {}]   ;;  %s532_s2 = inlined_call_operand.vmem [shape: f32[1,64], index: 2, kind: input, shape index: {}]   ;;  %s533_s3 = inlined_call_operand.vmem [shape: bf16[64,64], index: 3, kind: input, shape index: {}]   ;;  %s534_s4 = inlined_call_operand.vmem [shape: f32[1,64], index: 4, kind: input, shape index: {}]   ;;  %s535_s5 = inlined_call_operand.vmem [shape: bf16[64,32], index: 5, kind: input, shape index: {}]   ;;  %s536_s6 = inlined_call_operand.vmem [shape: f32[1,32], index: 6, kind: input, shape index: {}]   ;;  %s537_s7 = inlined_call_operand.hbm [shape: f32[8,32], index: 7, kind: output, shape index: {}]  }
   0x1   :  { %13 = vsyncpa [#allocation4], 0  ;;  %s416_s24 = smov [#allocation2]   ;;  %s368_s28 = scalar_lea.hbm %s530_s0, 64 }
   0x2   :  { %s20_s25 = sshll.u32 %s416_s24, 4  ;;  %p369_p0 = scmp.ne.s32.totalorder %s530_s0, %s368_s28  ;;  %s21_s25 = int_to_ptr.vmem [resolvable:$true] %s20_s25 }
   0x3   :  { %p372_p1 = scmp.lt.u32.totalorder %s368_s28, %s530_s0 }
   0x5   :  { %p374_p2 = pnand %p372_p1, %p369_p0 }
   0x7   :  { %377 = shalt.err (!%p374_p2)
}
   0x8   :  { %s378_s10 = scalar_lea.vmem %s21_s25, 64  ;;  %p383_p4 = scmp.lt.s32.totalorder %s21_s25, %s21_s25 }
   0x9   :  { %p379_p3 = scmp.ne.s32.totalorder %s21_s25, %s378_s10  ;;  %p384_p5 = scmp.lt.s32.totalorder %s378_s10, %s378_s10 }
   0xb   :  { %p385_p6 = por %p384_p5, %p383_p4 }
   0xd   :  { %p386_p7 = pnand %p385_p6, %p379_p3 }
   0xf   :  { %389 = shalt.err (!%p386_p7)
}
  0x10   :  { %23 = dma.hbm_to_vmem [thread:$0]  %s530_s0, 64, %s21_s25, [#allocation3]  }
  0x11   :  { %412 = dma.done.wait [#allocation3], 64  }
  0x12   :  { %413 = vsyncadd [#allocation3], 4294967232  ;;  %v417_v0 = vmov 0.0   ;;  %vm418_vm0 = vmmov 0   ;;  %v358_v1 = vld [vmem:[%s531_s1] sm:$0xff]   ;;  %v359_v2 = vld [vmem:[%s531_s1 + $0x8] sm:$0xff]  }
  0x13   :  { %322 = vmatprep.subr.bf16.mxu0 %v417_v0  ;;  %326 = vmatprep.mubr.msk.bf16.mxu0 %vm418_vm0, %v417_v0  ;;  %v360_v3 = vld [vmem:[%s533_s3] sm:$0xff]   ;;  %vm64_vm1 = vcmask 261120   ;;  %v361_v5 = vld [vmem:[%s533_s3 + $0x8] sm:$0xff]   ;;  %v362_v6 = vld [vmem:[%s533_s3 + $0x10] sm:$0xff]   ;;  %vm149_vm2 = vcmask 523264   ;;  %s419_s12 = smov [#allocation5]  }
  0x14   :  { %330 = vmatprep.subr.bf16.mxu1 %v417_v0  ;;  %338 = vmatprep.mubr.msk.bf16.mxu1 %vm418_vm0, %v417_v0  ;;  %v40_v4 = vld [vmem:[#allocation2] sm:$0xf]  ;;  %v363_v7 = vld [vmem:[%s533_s3 + $0x18] sm:$0xff]   ;;  %v365_v9 = vld [vmem:[%s535_s5 + $0x8] sm:$0xff]  }
  0x15   :  { %323 = vmatpush3.bf16.msra.mxu0 %v358_v1  ;;  %331 = vmatpush3.bf16.msra.mxu1 %v360_v3  ;;  %v364_v8 = vld [vmem:[%s535_s5] sm:$0xff]   ;;  %v366_v18 = vld [vmem:[%s535_s5 + $0x10] sm:$0xff]   ;;  %v367_v19 = vld [vmem:[%s535_s5 + $0x18] sm:$0xff]   ;;  %s284_s5 = sshll.u32 %s419_s12, 4  ;;  %s285_s5 = int_to_ptr.vmem [resolvable:$true] %s284_s5 }
  0x16   :  { %324 = vmatprep.subr.bf16.mxu0 %v417_v0  ;;  %332 = vmatprep.subr.bf16.mxu1 %v417_v0  ;;  %v293_v10 = vld [vmem:[%s532_s2] ss:$0 sm:$0xff]  ;;  %p395_p9 = scmp.lt.s32.totalorder %s285_s5, %s285_s5 }
  0x17   :  { %v297_v20 = vld [vmem:[%s534_s4] ss:$0 sm:$0xff]  ;;  %s390_s4 = scalar_lea.vmem %s285_s5, 128 }
  0x18   :  { %v303_v28 = vld [vmem:[%s536_s6] ss:$0 sm:$0xff]  ;;  %p391_p8 = scmp.ne.s32.totalorder %s285_s5, %s390_s4  ;;  %p396_p10 = scmp.lt.s32.totalorder %s390_s4, %s390_s4 }
  0x19   :  { %325 = vmatpush3.bf16.msra.mxu0 %v359_v2  ;;  %333 = vmatpush3.bf16.msra.mxu1 %v361_v5 }
  0x1a   :  { %342 = vmatprep.subr.bf16.mxu0 %v417_v0  ;;  %334 = vmatprep.subr.bf16.mxu1 %v417_v0  ;;  %p397_p11 = por %p396_p10, %p395_p9 }
  0x1c   :  { %327 = vmatmul.mubr.msk.bf16.vlgmr.msra.gmra.mrb[0].mxu0 %vm64_vm1, %v40_v4  ;;  %p398_p12 = pnand %p397_p11, %p391_p8 }
  0x1d   :  { %350 = vmatprep.mubr.msk.bf16.mxu0 %vm418_vm0, %v417_v0  ;;  %335 = vmatpush3.bf16.msra.mxu1 %v362_v6 }
  0x1e   :  { %336 = vmatprep.subr.bf16.mxu1 %v417_v0  ;;  %343 = vmatpush3.bf16.msra.mxu0 %v364_v8 }
  0x1f   :  { %344 = vmatprep.subr.bf16.mxu0 %v417_v0 }
  0x21   :  { %337 = vmatpush3.bf16.msra.mxu1 %v363_v7 }
  0x22   :  { %345 = vmatpush3.bf16.msra.mxu0 %v365_v9 }
  0x23   :  { %346 = vmatprep.subr.bf16.mxu0 %v417_v0 }
  0x26   :  { %347 = vmatpush3.bf16.msra.mxu0 %v366_v18 }
  0x27   :  { %348 = vmatprep.subr.bf16.mxu0 %v417_v0 }
  0x2a   :  { %349 = vmatpush3.bf16.msra.mxu0 %v367_v19 }
  0xef   :  { %v102_v11 = vpop.f32.mrb[0].mxu0 }
  0xf0   :  { %v103_v12 = vadd.f32 %v293_v10, %v102_v11  ;;  %v328_v13 = vpop.f32.mrb[1].mxu0 }
  0xf1   :  { %v105_v14 = vpop.f32.mrb[2].mxu0 }
  0xf2   :  { %v108_v15 = vmax.f32 %v103_v12, 0.0  ;;  %v329_v16 = vpop.f32.mrb[3].mxu0 }
  0xf4   :  { %v109_v17 = vpack.c.bf16 %v108_v15, %v108_v15 }
  0xf6   :  { %339 = vmatmul.mubr.msk.bf16.vlgmr.msra.gmra.mrb[0].mxu1 %vm149_vm2, %v109_v17 }
 0x1c9   :  { %v187_v21 = vpop.f32.mrb[0].mxu1 }
 0x1ca   :  { %v188_v22 = vadd.f32 %v297_v20, %v187_v21  ;;  %v340_v23 = vpop.f32.mrb[1].mxu1 }
 0x1cb   :  { %v190_v24 = vpop.f32.mrb[2].mxu1 }
 0x1cc   :  { %v193_v25 = vmax.f32 %v188_v22, 0.0  ;;  %v341_v26 = vpop.f32.mrb[3].mxu1 }
 0x1ce   :  { %v194_v27 = vpack.c.bf16 %v193_v25, %v193_v25 }
 0x1d0   :  { %351 = vmatmul.mubr.msk.bf16.vlgmr.msra.gmra.mrb[4].mxu0 %vm149_vm2, %v194_v27 }
 0x2a3   :  { %v271_v29 = vpop.f32.mrb[4].mxu0 }
 0x2a4   :  { %v272_v30 = vadd.f32 %v303_v28, %v271_v29  ;;  %v352_v31 = vpop.f32.mrb[5].mxu0 }
 0x2a5   :  { %v274_v32 = vpop.f32.mrb[6].mxu0 }
 0x2a6   :  { %277 = vst.msk [vmem:[#allocation5] sm:$0xff] %vm64_vm1, %v272_v30  ;;  %v353_v33 = vpop.f32.mrb[7].mxu0 }
 0x2a7   :  { %401 = shalt.err (!%p398_p12)
}
 0x2a8   :  { %s402_s6 = scalar_lea.hbm %s537_s7, 128 }
 0x2a9   :  { %p403_p13 = scmp.ne.s32.totalorder %s537_s7, %s402_s6  ;;  %p406_p0 = scmp.lt.u32.totalorder %s402_s6, %s537_s7 }
 0x2ab   :  { %p408_p1 = pnand %p406_p0, %p403_p13 }
 0x2ad   :  { %411 = shalt.err (!%p408_p1)
}
 0x2ae   :  { %287 = dma.vmem_to_hbm [thread:$0]  %s285_s5, 128, %s537_s7, [#allocation4]  }
 0x2af   :  { %414 = dma.done.wait [#allocation4], 128  }
 0x2b0   :  { %415 = vsyncadd [#allocation4], 4294967168 }
 0x2b1   :  { %291 = vsyncpa [#allocation3], 1 }
 0x2b2   :  { %292 = vsyncpa [#allocation4], 1 }

</bundles_post_ra>
